<compile_context>
chip_gen: v6e
topology: v6e:2x2x1
jax: 0.10.0
libtpu: 0.0.40
codegen_flags: <defaults>
</compile_context>

<pallas_src>
import jax
import jax.numpy as jnp
from jax.experimental import pallas as pl
from jax.experimental.pallas import tpu as pltpu


def _round_up(a, b):
    return (a + b - 1) // b * b


def _next_pow2(n):
    p = 1
    while p < n:
        p *= 2
    return p


def _make_gemm_epilogue_kernel(relu, k_tiled):
    """GEMM + per-channel f32 scale/shift + optional ReLU.

    k_tiled=False: grid = (m_tiles,), single full-K block, direct store.
    k_tiled=True : grid = (m_tiles, k_tiles); accumulate directly into the
                   resident f32 output block, epilogue on the last k step
                   (no scratch accumulator).
    """
    if not k_tiled:
        def kernel(lhs_ref, rhs_ref, scale_ref, shift_ref, o_ref):
            y = jnp.dot(lhs_ref[...], rhs_ref[...],
                        preferred_element_type=jnp.float32)
            y = y * scale_ref[...] + shift_ref[...]
            if relu:
                y = jnp.maximum(y, 0.0)
            o_ref[...] = y.astype(o_ref.dtype)

        return kernel

    def kernel(lhs_ref, rhs_ref, scale_ref, shift_ref, o_ref):
        k = pl.program_id(1)

        @pl.when(k == 0)
        def _():
            o_ref[...] = jnp.zeros_like(o_ref)

        o_ref[...] += jnp.dot(lhs_ref[...], rhs_ref[...],
                              preferred_element_type=jnp.float32)

        @pl.when(k == pl.num_programs(1) - 1)
        def _():
            y = o_ref[...] * scale_ref[...] + shift_ref[...]
            if relu:
                y = jnp.maximum(y, 0.0)
            o_ref[...] = y

    return kernel


def _im2col(x_nhwc_padded, KH, KW, stride, H_out, W_out):
    """(N, Hp, Wp, Cin) -> (N, H_out, W_out, KH*KW*Cin), tap-major, Cin fastest."""
    cols = []
    for kh in range(KH):
        for kw in range(KW):
            h_stop = kh + (H_out - 1) * stride + 1
            w_stop = kw + (W_out - 1) * stride + 1
            cols.append(x_nhwc_padded[:, kh:h_stop:stride, kw:w_stop:stride, :])
    return jnp.concatenate(cols, axis=-1)


def _bilinear_resize_nchw(x, out_h, out_w, align_corners=True):
    """Bilinear resize matching legacy PyTorch F.upsample(mode='bilinear').

    align_corners=True reproduces the legacy semantics the original module
    relied on; align_corners=False is a best-effort half-pixel variant.
    """
    n, c, h, w = x.shape
    if align_corners:
        ys = jnp.linspace(0.0, float(h - 1), out_h)
        xs = jnp.linspace(0.0, float(w - 1), out_w)
    else:
        ys = jnp.maximum(
            (jnp.arange(out_h, dtype=jnp.float32) + 0.5) * (h / out_h) - 0.5, 0.0)
        xs = jnp.maximum(
            (jnp.arange(out_w, dtype=jnp.float32) + 0.5) * (w / out_w) - 0.5, 0.0)
    y0 = jnp.clip(jnp.floor(ys), 0, h - 1).astype(jnp.int32)
    x0 = jnp.clip(jnp.floor(xs), 0, w - 1).astype(jnp.int32)
    y1 = jnp.minimum(y0 + 1, h - 1)
    x1 = jnp.minimum(x0 + 1, w - 1)
    wy = (ys - y0.astype(ys.dtype))[None, None, :, None]
    wx = (xs - x0.astype(xs.dtype))[None, None, None, :]
    top = x[:, :, y0, :]
    bot = x[:, :, y1, :]
    v = top * (1.0 - wy) + bot * wy
    return v[:, :, :, x0] * (1.0 - wx) + v[:, :, :, x1] * wx


def basic_conv(
    x_nchw,
    weight_oihw,
    bias=None,
    *,
    stride=1,
    padding=0,
    relu=True,
    bn=False,
    bn_params=None,   # (gamma, beta, running_mean, running_var, eps) if bn
    up_size=None,
):
    """Forward pass of BasicConv.  x_nchw: (N, Cin, H, W) float32, NCHW."""
    N, Cin, H, W = x_nchw.shape
    Cout, Cin_w, KH, KW = weight_oihw.shape
    # TODO(synk): groups > 1 and dilation > 1 not supported.
    assert Cin_w == Cin

    H_out = (H + 2 * padding - KH) // stride + 1
    W_out = (W + 2 * padding - KW) // stride + 1
    M = N * H_out * W_out
    Kdim = KH * KW * Cin

    # ---- glue: NHWC + bf16 cast BEFORE im2col (the patch tensor is the
    # dominant HBM object, so it is built/streamed in bf16), pad, im2col.
    # TODO(synk): for production shapes move the halo/im2col into the kernel
    # (BlockSpec windows over H with KH-1 halo rows) instead of materializing
    # the (M, KH*KW*Cin) patch tensor in HBM.
    x = jnp.transpose(x_nchw, (0, 2, 3, 1)).astype(jnp.bfloat16)      # NHWC
    x = jnp.pad(x, ((0, 0), (padding, padding), (padding, padding), (0, 0)))
    patches = _im2col(x, KH, KW, stride, H_out, W_out)                # (N,Ho,Wo,K)
    lhs2d = patches.reshape(M, Kdim)                                  # bf16

    # ---- per-channel affine: BN scale stays f32 in the epilogue (not folded
    # into bf16 weights); conv bias / BN shift fused into one f32 add.
    b = bias if bias is not None else jnp.zeros((Cout,), jnp.float32)
    b = b.astype(jnp.float32)
    if bn:
        gamma, beta, mean, var, eps = bn_params
        s = gamma.astype(jnp.float32) / jnp.sqrt(var.astype(jnp.float32) + eps)
        scale = s
        shift = (b - mean.astype(jnp.float32)) * s + beta.astype(jnp.float32)
    else:
        scale = jnp.ones((Cout,), jnp.float32)
        shift = b

    # ---- GEMM geometry ------------------------------------------------------
    # Pixel packing: G output pixels share one 128-wide lane row so the output
    # store is lane-dense without padding Cout up to 128.
    if Cout >= 128:
        Cp = _round_up(Cout, 128)
        G = 1
    else:
        Cp = _next_pow2(Cout)       # divides 128
        G = 128 // Cp
    N_lane = G * Cp                 # 128 whenever Cout < 128

    Kp = _round_up(Kdim, 16)        # bf16 sublane pack only; no 128-pad of K
    Kpk = G * Kp                    # packed contraction length

    K_SINGLE_MAX = 4096             # single-block K up to this many bf16 lanes
    if Kpk <= K_SINGLE_MAX:
        TKpk, Kpk_pad, k_tiles = Kpk, Kpk, 1
    else:
        TKpk = 1024
        Kpk_pad = _round_up(Kpk, TKpk)
        k_tiles = Kpk_pad // TKpk

    # Row-tile size from a VMEM budget that fits every generation (v7x is the
    # tightest: 64 MiB physical / 32 MiB scoped) with double-buffer headroom.
    VMEM_BUDGET = 20 * 1024 * 1024
    fixed = 2 * TKpk * N_lane * 2                        # double-buffered rhs
    per_row = 2 * (TKpk * 2 + N_lane * 4)                # lhs (bf16) + out (f32)
    TMP_max = max(8, min(1024, (VMEM_BUDGET - fixed) // per_row // 8 * 8))

    Mpk_total = -(-M // G)                               # packed rows needed
    TMP = min(_round_up(Mpk_total, 8), TMP_max)
    Mpk_pad = _round_up(Mpk_total, TMP)
    m_tiles = Mpk_pad // TMP
    Mp_unpacked = Mpk_pad * G

    # ---- operands -----------------------------------------------------------
    lhs = jnp.pad(lhs2d, ((0, Mp_unpacked - M), (0, Kp - Kdim)))
    lhs = lhs.reshape(Mpk_pad, G * Kp)                   # contiguous reshape
    if Kpk_pad > Kpk:
        lhs = jnp.pad(lhs, ((0, 0), (0, Kpk_pad - Kpk)))
    lhs = lhs.astype(jnp.bfloat16)

    # weights: (Cout,Cin,KH,KW) -> (KH,KW,Cin,Cout) -> (Kdim,Cout), pad, then
    # block-diagonal replicate (kron) so G pixels map to G disjoint lane groups.
    w2d = jnp.transpose(weight_oihw, (2, 3, 1, 0)).reshape(Kdim, Cout)
    w2d = jnp.pad(w2d.astype(jnp.float32), ((0, Kp - Kdim), (0, Cp - Cout)))
    rhs = jnp.kron(jnp.eye(G, dtype=jnp.float32), w2d)   # (G*Kp, G*Cp)
    if Kpk_pad > Kpk:
        rhs = jnp.pad(rhs, ((0, Kpk_pad - Kpk), (0, 0)))
    rhs = rhs.astype(jnp.bfloat16)

    scale_p = jnp.tile(jnp.pad(scale, (0, Cp - Cout)), G).reshape(1, N_lane)
    shift_p = jnp.tile(jnp.pad(shift, (0, Cp - Cout)), G).reshape(1, N_lane)

    # ---- Pallas hot path ----------------------------------------------------
    kernel = _make_gemm_epilogue_kernel(relu, k_tiles > 1)
    if k_tiles == 1:
        grid = (m_tiles,)
        in_specs = [
            pl.BlockSpec((TMP, Kpk_pad), lambda i: (i, 0)),      # lhs tile
            pl.BlockSpec((Kpk_pad, N_lane), lambda i: (0, 0)),   # full rhs
            pl.BlockSpec((1, N_lane), lambda i: (0, 0)),         # scale (f32)
            pl.BlockSpec((1, N_lane), lambda i: (0, 0)),         # shift (f32)
        ]
        out_spec = pl.BlockSpec((TMP, N_lane), lambda i: (i, 0))
        dims = ("parallel",)
    else:
        grid = (m_tiles, k_tiles)
        in_specs = [
            pl.BlockSpec((TMP, TKpk), lambda i, k: (i, k)),
            pl.BlockSpec((TKpk, N_lane), lambda i, k: (k, 0)),
            pl.BlockSpec((1, N_lane), lambda i, k: (0, 0)),
            pl.BlockSpec((1, N_lane), lambda i, k: (0, 0)),
        ]
        out_spec = pl.BlockSpec((TMP, N_lane), lambda i, k: (i, 0))
        dims = ("parallel", "arbitrary")

    out_packed = pl.pallas_call(
        kernel,
        out_shape=jax.ShapeDtypeStruct((Mpk_pad, N_lane), jnp.float32),
        grid=grid,
        in_specs=in_specs,
        out_specs=out_spec,
        compiler_params=pltpu.CompilerParams(
            dimension_semantics=dims,
            vmem_limit_bytes=32 * 1024 * 1024,
        ),
    )(lhs, rhs, scale_p, shift_p)

    out = out_packed.reshape(Mpk_pad * G, Cp)[:M, :Cout]
    out = out.reshape(N, H_out, W_out, Cout)
    out = jnp.transpose(out, (0, 3, 1, 2))               # back to NCHW

    if up_size is not None:
        # Legacy F.upsample(mode='bilinear') == align_corners=True sampling.
        out = _bilinear_resize_nchw(out, up_size[0], up_size[1],
                                    align_corners=True)
    return out


if __name__ == "__main__":
    key = jax.random.PRNGKey(0)
    kx, kw, kb, kx2, kw2, kb2, kg, kbe, km, kv = jax.random.split(key, 10)

    # ---- Test 1: BasicConv(4, 8, kernel_size=3, stride=1, padding=1, relu=True)
    N, Cin, H, W = 2, 4, 16, 16
    Cout, K = 8, 3
    x = jax.random.normal(kx, (N, Cin, H, W), jnp.float32)
    weight = 0.1 * jax.random.normal(kw, (Cout, Cin, K, K), jnp.float32)
    bias = 0.1 * jax.random.normal(kb, (Cout,), jnp.float32)

    out = basic_conv(x, weight, bias, stride=1, padding=1, relu=True)
    out = jax.block_until_ready(out)
    assert out.shape == (N, Cout, H, W), out.shape

    ref = jax.lax.conv_general_dilated(
        x, weight, window_strides=(1, 1), padding=[(1, 1), (1, 1)],
        dimension_numbers=("NCHW", "OIHW", "NCHW"))
    ref = jnp.maximum(ref + bias[None, :, None, None], 0.0)
    err = float(jnp.max(jnp.abs(out - ref)))
    assert jnp.allclose(out, ref, atol=5e-2, rtol=5e-2), err

    # ---- Test 2: BN + larger Cin exercises the K-tiled accumulate-into-o_ref path.
    N2, Cin2, H2, W2, Cout2 = 1, 32, 8, 8, 8
    x2 = jax.random.normal(kx2, (N2, Cin2, H2, W2), jnp.float32)
    w2 = 0.1 * jax.random.normal(kw2, (Cout2, Cin2, K, K), jnp.float32)
    b2 = 0.1 * jax.random.normal(kb2, (Cout2,), jnp.float32)
    gamma = 1.0 + 0.1 * jax.random.normal(kg, (Cout2,), jnp.float32)
    beta = 0.1 * jax.random.normal(kbe, (Cout2,), jnp.float32)
    mean = 0.1 * jax.random.normal(km, (Cout2,), jnp.float32)
    var = jax.random.uniform(kv, (Cout2,), jnp.float32, 0.5, 1.5)
    eps = 1e-5

    out2 = basic_conv(x2, w2, b2, stride=1, padding=1, relu=True,
                      bn=True, bn_params=(gamma, beta, mean, var, eps))
    out2 = jax.block_until_ready(out2)

    ref2 = jax.lax.conv_general_dilated(
        x2, w2, window_strides=(1, 1), padding=[(1, 1), (1, 1)],
        dimension_numbers=("NCHW", "OIHW", "NCHW")) + b2[None, :, None, None]
    ref2 = (ref2 - mean[None, :, None, None]) / jnp.sqrt(var + eps)[None, :, None, None]
    ref2 = ref2 * gamma[None, :, None, None] + beta[None, :, None, None]
    ref2 = jnp.maximum(ref2, 0.0)
    err2 = float(jnp.max(jnp.abs(out2 - ref2)))
    assert jnp.allclose(out2, ref2, atol=5e-2, rtol=5e-2), err2

    # ---- Test 3: upsample path (align_corners=True glue); shape check.
    out3 = basic_conv(x, weight, bias, stride=1, padding=1, relu=True,
                      up_size=(32, 32))
    out3 = jax.block_until_ready(out3)
    assert out3.shape == (N, Cout, 32, 32), out3.shape

    print("KERNEL_OK")
</pallas_src>

<mosaic_0001>
module attributes {stable_mosaic.version = 11 : i64} {
  func.func @kernel(%arg0: i32, %arg1: memref<32x768xbf16, #tpu.memory_space<vmem>>, %arg2: memref<768x128xbf16, #tpu.memory_space<vmem>>, %arg3: memref<1x128xf32, #tpu.memory_space<vmem>>, %arg4: memref<1x128xf32, #tpu.memory_space<vmem>>, %arg5: memref<32x128xf32, #tpu.memory_space<vmem>>) attributes {dimension_semantics = [#tpu.dimension_semantics<parallel>], iteration_bounds = array<i64: 1>, scalar_prefetch = 0 : i64, scratch_operands = 0 : i64, tpu.core_type = #tpu.core_type<tc>, window_params = [{transform_indices = @transform_0, window_bounds = array<i64: 32, 768>}, {pipeline_mode = #tpu.pipeline_mode<synchronous>, transform_indices = @transform_1, window_bounds = array<i64: 768, 128>}, {pipeline_mode = #tpu.pipeline_mode<synchronous>, transform_indices = @transform_2, window_bounds = array<i64: 1, 128>}, {pipeline_mode = #tpu.pipeline_mode<synchronous>, transform_indices = @transform_3, window_bounds = array<i64: 1, 128>}, {transform_indices = @transform_4, window_bounds = array<i64: 32, 128>}]} {
    %c0 = arith.constant 0 : index
    %c0_0 = arith.constant 0 : index
    %0 = vector.load %arg1[%c0, %c0_0] : memref<32x768xbf16, #tpu.memory_space<vmem>>, vector<32x768xbf16>
    %c0_1 = arith.constant 0 : index
    %c0_2 = arith.constant 0 : index
    %1 = vector.load %arg2[%c0_1, %c0_2] : memref<768x128xbf16, #tpu.memory_space<vmem>>, vector<768x128xbf16>
    %cst = arith.constant dense<0.000000e+00> : vector<32x128xf32>
    %2 = tpu.matmul %0, %1, %cst {dimension_numbers = #tpu.dot_dimension_numbers<[1], [0], [0], [1], [0, 0, 1, 1], [], []>} : vector<32x768xbf16>, vector<768x128xbf16>, vector<32x128xf32> -> vector<32x128xf32>
    %c0_3 = arith.constant 0 : index
    %c0_4 = arith.constant 0 : index
    %3 = vector.load %arg3[%c0_3, %c0_4] : memref<1x128xf32, #tpu.memory_space<vmem>>, vector<1x128xf32>
    %4 = vector.broadcast %3 : vector<1x128xf32> to vector<32x128xf32>
    %5 = arith.mulf %2, %4 : vector<32x128xf32>
    %c0_5 = arith.constant 0 : index
    %c0_6 = arith.constant 0 : index
    %6 = vector.load %arg4[%c0_5, %c0_6] : memref<1x128xf32, #tpu.memory_space<vmem>>, vector<1x128xf32>
    %7 = vector.broadcast %6 : vector<1x128xf32> to vector<32x128xf32>
    %8 = arith.addf %5, %7 : vector<32x128xf32>
    %cst_7 = arith.constant 0.000000e+00 : f32
    %9 = vector.broadcast %cst_7 : f32 to vector<32x128xf32>
    %10 = arith.maximumf %8, %9 : vector<32x128xf32>
    %c0_8 = arith.constant 0 : index
    %c0_9 = arith.constant 0 : index
    %11 = vector.load %arg5[%c0_8, %c0_9] : memref<32x128xf32, #tpu.memory_space<vmem>>, vector<32x128xf32>
    tpu.vector_store %arg5[%c0_8, %c0_9], %10 {strides = array<i32>} : memref<32x128xf32, #tpu.memory_space<vmem>>, vector<32x128xf32>,
    return
  }
  func.func @transform_0(%arg0: i32) -> (i32, i32) {
    %c0_i32 = arith.constant 0 : i32
    %c0_i32_0 = arith.constant 0 : i32
    return %arg0, %c0_i32 : i32, i32
  }
  func.func @transform_1(%arg0: i32) -> (i32, i32) {
    %c0_i32 = arith.constant 0 : i32
    %c0_i32_0 = arith.constant 0 : i32
    %c0_i32_1 = arith.constant 0 : i32
    return %c0_i32, %c0_i32_0 : i32, i32
  }
  func.func @transform_2(%arg0: i32) -> (i32, i32) {
    %c0_i32 = arith.constant 0 : i32
    %c0_i32_0 = arith.constant 0 : i32
    %c0_i32_1 = arith.constant 0 : i32
    return %c0_i32, %c0_i32_0 : i32, i32
  }
  func.func @transform_3(%arg0: i32) -> (i32, i32) {
    %c0_i32 = arith.constant 0 : i32
    %c0_i32_0 = arith.constant 0 : i32
    %c0_i32_1 = arith.constant 0 : i32
    return %c0_i32, %c0_i32_0 : i32, i32
  }
  func.func @transform_4(%arg0: i32) -> (i32, i32) {
    %c0_i32 = arith.constant 0 : i32
    %c0_i32_0 = arith.constant 0 : i32
    return %arg0, %c0_i32 : i32, i32
  }
}

</mosaic_0001>

<bundles_post_ra>
// kernel: tpu_custom_call.1
= control target key start
LH: loop header
LB: loop body
LE: loop exit
PB: predicated region body
PF: predicated region fallthrough
CT: control target
= control target key end

     0   :  { %9 = vsyncpa [#allocation3], 0  ;;  %s1050_s0 = inlined_call_operand.hbm [shape: bf16[32,768], index: 0, kind: input, shape index: {}]   ;;  %s1051_s1 = inlined_call_operand.hbm [shape: bf16[768,128], index: 1, kind: input, shape index: {}]   ;;  %s1052_s2 = inlined_call_operand.vmem [shape: f32[1,128], index: 2, kind: input, shape index: {}]   ;;  %s1053_s3 = inlined_call_operand.vmem [shape: f32[1,128], index: 3, kind: input, shape index: {}]   ;;  %s1054_s4 = inlined_call_operand.hbm [shape: f32[32,128], index: 4, kind: output, shape index: {}]  }
   0x1   :  { %10 = vsyncpa [#allocation6], 0 }
   0x2   :  { %11 = vsyncpa [#allocation4], 0  ;;  %s1001_s15 = smov [#allocation2]  }
   0x3   :  { %s17_s16 = sshll.u32 %s1001_s15, 4  ;;  %s18_s16 = int_to_ptr.vmem [resolvable:$true] %s17_s16 }
   0x4   :  { %s943_s17 = scalar_lea.vmem %s18_s16, 1536  ;;  %p948_p1 = scmp.lt.s32.totalorder %s18_s16, %s18_s16 }
   0x5   :  { %p944_p0 = scmp.ne.s32.totalorder %s18_s16, %s943_s17  ;;  %p949_p2 = scmp.lt.s32.totalorder %s943_s17, %s943_s17 }
   0x7   :  { %p950_p3 = por %p949_p2, %p948_p1 }
   0x9   :  { %p951_p4 = pnand %p950_p3, %p944_p0 }
   0xb   :  { %954 = shalt.err (!%p951_p4)
}
   0xc   :  { %s1002_s18 = smov 384   ;;  %s1003_s19 = smov 24  }
   0xd   :  { %23 = dma.hbm_to_vmem [thread:$0]  %s1050_s0, 1536, %s18_s16, [#allocation3], %s1002_s18, %s1002_s18, %s1003_s19  }
   0xe   :  { %s1004_s22 = smov [#allocation5]  }
   0xf   :  { %s29_s23 = sshll.u32 %s1004_s22, 4  ;;  %s30_s23 = int_to_ptr.vmem [resolvable:$true] %s29_s23 }
  0x10   :  { %s963_s24 = scalar_lea.vmem %s30_s23, 6144  ;;  %p968_p6 = scmp.lt.s32.totalorder %s30_s23, %s30_s23 }
  0x11   :  { %p964_p5 = scmp.ne.s32.totalorder %s30_s23, %s963_s24  ;;  %p969_p7 = scmp.lt.s32.totalorder %s963_s24, %s963_s24 }
  0x13   :  { %p970_p8 = por %p969_p7, %p968_p6 }
  0x15   :  { %p971_p9 = pnand %p970_p8, %p964_p5 }
  0x17   :  { %974 = shalt.err (!%p971_p9)
}
  0x18   :  { %s1005_s25 = smov 64   ;;  %s1006_s26 = smov 4  }
  0x19   :  { %35 = dma.hbm_to_vmem [thread:$0]  %s1051_s1, 6144, %s30_s23, [#allocation6], %s1005_s25, %s1005_s25, %s1006_s26  }
  0x1a   :  { %995 = dma.done.wait [#allocation3], 1536  }
  0x1b   :  { %996 = vsyncadd [#allocation3], 4294965760 }
  0x1c   :  { %997 = dma.done.wait [#allocation6], 6144  }
  0x1d   :  { %998 = vsyncadd [#allocation6], 4294961152  ;;  %v869_v0 = vld [vmem:[#allocation5 + $0x78] sm:$0xff]   ;;  %v873_v4 = vld [vmem:[#allocation5 + $0x70] sm:$0xff]  }
  0x1e   :  { %v870_v1 = vld [vmem:[#allocation5 + $0xf8] sm:$0xff]   ;;  %760 = vmatprep.subr.bf16.mxu0 %v869_v0  ;;  %v874_v5 = vld [vmem:[#allocation5 + $0xf0] sm:$0xff]   ;;  %v877_v8 = vld [vmem:[#allocation5 + $0x68] sm:$0xff]  }
  0x1f   :  { %v871_v2 = vld [vmem:[#allocation5 + $0x38] sm:$0xff]   ;;  %788 = vmatprep.subr.bf16.mxu1 %v870_v1  ;;  %v875_v6 = vld [vmem:[#allocation5 + $0x30] sm:$0xff]   ;;  %v878_v9 = vld [vmem:[#allocation5 + $0xe8] sm:$0xff]  }
  0x20   :  { %v872_v3 = vld [vmem:[#allocation5 + $0xb8] sm:$0xff]   ;;  %761 = vmatpush3.bf16.msra.mxu0 %v871_v2  ;;  %v876_v7 = vld [vmem:[#allocation5 + $0xb0] sm:$0xff]   ;;  %v879_v10 = vld [vmem:[#allocation5 + $0x28] sm:$0xff]  }
  0x21   :  { %789 = vmatpush3.bf16.msra.mxu1 %v872_v3  ;;  %762 = vmatprep.subr.bf16.mxu0 %v873_v4  ;;  %v880_v11 = vld [vmem:[#allocation5 + $0xa8] sm:$0xff]   ;;  %v881_v12 = vld [vmem:[#allocation5 + $0x60] sm:$0xff]   ;;  %v885_v16 = vld [vmem:[#allocation5 + $0x58] sm:$0xff]  }
  0x22   :  { %790 = vmatprep.subr.bf16.mxu1 %v874_v5  ;;  %v882_v13 = vld [vmem:[#allocation5 + $0xe0] sm:$0xff]   ;;  %v886_v17 = vld [vmem:[#allocation5 + $0xd8] sm:$0xff]   ;;  %v889_v20 = vld [vmem:[#allocation5 + $0x50] sm:$0xff]  }
  0x23   :  { %v883_v14 = vld [vmem:[#allocation5 + $0x20] sm:$0xff]   ;;  %v887_v18 = vld [vmem:[#allocation5 + $0x18] sm:$0xff]   ;;  %v890_v21 = vld [vmem:[#allocation5 + $0xd0] sm:$0xff]  }
  0x24   :  { %763 = vmatpush3.bf16.msra.mxu0 %v875_v6  ;;  %v884_v15 = vld [vmem:[#allocation5 + $0xa0] sm:$0xff]   ;;  %v888_v19 = vld [vmem:[#allocation5 + $0x98] sm:$0xff]   ;;  %v891_v22 = vld [vmem:[#allocation5 + $0x10] sm:$0xff]  }
  0x25   :  { %791 = vmatpush3.bf16.msra.mxu1 %v876_v7  ;;  %764 = vmatprep.subr.bf16.mxu0 %v877_v8  ;;  %v892_v23 = vld [vmem:[#allocation5 + $0x90] sm:$0xff]   ;;  %v893_v24 = vld [vmem:[#allocation5 + $0x48] sm:$0xff]   ;;  %v897_v28 = vld [vmem:[#allocation5 + $0x40] sm:$0xff]  }
  0x26   :  { %792 = vmatprep.subr.bf16.mxu1 %v878_v9  ;;  %v894_v25 = vld [vmem:[#allocation5 + $0xc8] sm:$0xff]   ;;  %v898_v29 = vld [vmem:[#allocation5 + $0xc0] sm:$0xff]   ;;  %v907_v36 = vld [vmem:[#allocation5 + $0x178] sm:$0xff]  }
  0x27   :  { %v895_v26 = vld [vmem:[#allocation5 + $0x8] sm:$0xff]   ;;  %v899_v30 = vld [vmem:[#allocation5] sm:$0xff]   ;;  %v908_v37 = vld [vmem:[#allocation5 + $0x138] sm:$0xff]  }
  0x28   :  { %765 = vmatpush3.bf16.msra.mxu0 %v879_v10  ;;  %v896_v27 = vld [vmem:[#allocation5 + $0x88] sm:$0xff]   ;;  %v900_v31 = vld [vmem:[#allocation5 + $0x80] sm:$0xff]   ;;  %v909_v38 = vld [vmem:[#allocation5 + $0x170] sm:$0xff]  }
  0x29   :  { %793 = vmatpush3.bf16.msra.mxu1 %v880_v11  ;;  %766 = vmatprep.subr.bf16.mxu0 %v881_v12  ;;  %v901_v32 = vld [vmem:[#allocation2] ss:$24 sps:$4 sm:$0xff]   ;;  %v903_v33 = vld [vmem:[#allocation2 + $0x4] ss:$24 sps:$4 sm:$0xff]   ;;  %v910_v39 = vld [vmem:[#allocation5 + $0x130] sm:$0xff]  }
  0x2a   :  { %794 = vmatprep.subr.bf16.mxu1 %v882_v13  ;;  %v904_v34 = vld [vmem:[#allocation2 + $0x8] ss:$24 sps:$4 sm:$0xff]   ;;  %v906_v35 = vld [vmem:[#allocation2 + $0xc] ss:$24 sps:$4 sm:$0xff]   ;;  %535 = vmatprep.mubr.bf16.mxu0 %v903_v33  ;;  %v918_v45 = vld [vmem:[#allocation2 + $0x3c] ss:$24 sps:$4 sm:$0xff]  }
  0x2b   :  { %584 = vmatprep.mubr.bf16.mxu1 %v906_v35  ;;  %v911_v40 = vld [vmem:[#allocation5 + $0x168] sm:$0xff]   ;;  %v913_v42 = vld [vmem:[#allocation5 + $0x160] sm:$0xff]   ;;  %v915_v46 = vld [vmem:[#allocation5 + $0x158] sm:$0xff]  }
  0x2c   :  { %767 = vmatpush3.bf16.msra.mxu0 %v883_v14  ;;  %v912_v41 = vld [vmem:[#allocation5 + $0x128] sm:$0xff]   ;;  %v914_v43 = vld [vmem:[#allocation5 + $0x120] sm:$0xff]   ;;  %v922_v48 = vld [vmem:[#allocation2 + $0x38] ss:$24 sps:$4 sm:$0xff]  }
  0x2d   :  { %795 = vmatpush3.bf16.msra.mxu1 %v884_v15  ;;  %768 = vmatprep.subr.bf16.mxu0 %v885_v16  ;;  %v916_v44 = vld [vmem:[#allocation2 + $0x34] ss:$24 sps:$4 sm:$0xff]   ;;  %v921_v47 = vld [vmem:[#allocation2 + $0x30] ss:$24 sps:$4 sm:$0xff]   ;;  %v920_v49 = vld [vmem:[#allocation5 + $0x118] sm:$0xff]  }
  0x2e   :  { %796 = vmatprep.subr.bf16.mxu1 %v886_v17  ;;  %v923_v50 = vld [vmem:[#allocation5 + $0x150] sm:$0xff]   ;;  %v925_v53 = vld [vmem:[#allocation5 + $0x148] sm:$0xff]   ;;  %v934_v54 = vld [vmem:[#allocation2 + $0x44] ss:$24 sps:$4 sm:$0xff]  }
  0x2f   :  { %v924_v51 = vld [vmem:[#allocation5 + $0x110] sm:$0xff]   ;;  %v926_v55 = vld [vmem:[#allocation5 + $0x108] sm:$0xff]   ;;  %v927_v56 = vld [vmem:[#allocation5 + $0x140] sm:$0xff]  }
  0x30   :  { %769 = vmatpush3.bf16.msra.mxu0 %v887_v18  ;;  %v931_v52 = vld [vmem:[#allocation2 + $0x14] ss:$24 sps:$4 sm:$0xff]   ;;  %v928_v57 = vld [vmem:[#allocation5 + $0x100] sm:$0xff]   ;;  %v929_v58 = vld [vmem:[#allocation2 + $0x10] ss:$24 sps:$4 sm:$0xff]  }
  0x31   :  { %797 = vmatpush3.bf16.msra.mxu1 %v888_v19  ;;  %770 = vmatprep.subr.bf16.mxu0 %v889_v20  ;;  %v932_v59 = vld [vmem:[#allocation2 + $0x40] ss:$24 sps:$4 sm:$0xff]  }
  0x32   :  { %798 = vmatprep.subr.bf16.mxu1 %v890_v21 }
  0x34   :  { %771 = vmatpush3.bf16.msra.mxu0 %v891_v22 }
  0x35   :  { %799 = vmatpush3.bf16.msra.mxu1 %v892_v23  ;;  %772 = vmatprep.subr.bf16.mxu0 %v893_v24 }
  0x36   :  { %800 = vmatprep.subr.bf16.mxu1 %v894_v25 }
  0x38   :  { %773 = vmatpush3.bf16.msra.mxu0 %v895_v26 }
  0x39   :  { %801 = vmatpush3.bf16.msra.mxu1 %v896_v27  ;;  %774 = vmatprep.subr.bf16.mxu0 %v897_v28  ;;  %v758_v27 = vld [vmem:[%s1052_s2] ss:$0 sm:$0xff]  ;;  %s1007_s2 = smov [#allocation7]  }
  0x3a   :  { %802 = vmatprep.subr.bf16.mxu1 %v898_v29  ;;  %s685_s5 = sshll.u32 %s1007_s2, 4  ;;  %s686_s5 = int_to_ptr.vmem [resolvable:$true] %s685_s5 }
  0x3b   :  { %p980_p11 = scmp.lt.s32.totalorder %s686_s5, %s686_s5 }
  0x3c   :  { %775 = vmatpush3.bf16.msra.mxu0 %v899_v30 }
  0x3d   :  { %803 = vmatpush3.bf16.msra.mxu1 %v900_v31  ;;  %816 = vmatprep.subr.bf16.mxu0 %v907_v36 }
  0x3e   :  { %844 = vmatprep.subr.bf16.mxu1 %v907_v36 }
  0x3f   :  { %536 = vmatmul.mubr.bf16.vlgmr.msra.gmra.mxu0 %v901_v32  ;;  %v759_v32 = vld [vmem:[%s1053_s3] ss:$0 sm:$0xff]  ;;  %s975_s3 = scalar_lea.vmem %s686_s5, 512 }
  0x40   :  { %585 = vmatmul.mubr.bf16.vlgmr.msra.gmra.mxu1 %v904_v34  ;;  %817 = vmatpush3.bf16.msra.mxu0 %v908_v37  ;;  %p976_p10 = scmp.ne.s32.totalorder %s686_s5, %s975_s3  ;;  %p981_p12 = scmp.lt.s32.totalorder %s975_s3, %s975_s3 }
  0x41   :  { %852 = vmatpush3.bf16.msra.mxu1 %v908_v37  ;;  %818 = vmatprep.subr.bf16.mxu0 %v909_v38 }
  0x42   :  { %845 = vmatprep.subr.bf16.mxu1 %v909_v38  ;;  %543 = vmatprep.mubr.bf16.mxu0 %v916_v44  ;;  %p982_p13 = por %p981_p12, %p980_p11 }
  0x43   :  { %592 = vmatprep.mubr.bf16.mxu1 %v918_v45 }
  0x44   :  { %819 = vmatpush3.bf16.msra.mxu0 %v910_v39  ;;  %p983_p0 = pnand %p982_p13, %p976_p10 }
  0x45   :  { %853 = vmatpush3.bf16.msra.mxu1 %v910_v39  ;;  %820 = vmatprep.subr.bf16.mxu0 %v911_v40 }
  0x46   :  { %846 = vmatprep.subr.bf16.mxu1 %v911_v40 }
  0x47   :  { %544 = vmatmul.mubr.bf16.gmra.mxu0 %v921_v47 }
  0x48   :  { %821 = vmatpush3.bf16.msra.mxu0 %v912_v41  ;;  %593 = vmatmul.mubr.bf16.gmra.mxu1 %v922_v48 }
  0x49   :  { %854 = vmatpush3.bf16.msra.mxu1 %v912_v41  ;;  %822 = vmatprep.subr.bf16.mxu0 %v913_v42 }
  0x4a   :  { %847 = vmatprep.subr.bf16.mxu1 %v913_v42  ;;  %633 = vmatprep.mubr.bf16.mxu0 %v931_v52 }
  0x4b   :  { %641 = vmatprep.mubr.bf16.mxu1 %v934_v54 }
  0x4c   :  { %823 = vmatpush3.bf16.msra.mxu0 %v914_v43 }
  0x4d   :  { %855 = vmatpush3.bf16.msra.mxu1 %v914_v43  ;;  %824 = vmatprep.subr.bf16.mxu0 %v915_v46 }
  0x4e   :  { %848 = vmatprep.subr.bf16.mxu1 %v915_v46 }
  0x50   :  { %825 = vmatpush3.bf16.msra.mxu0 %v920_v49 }
  0x51   :  { %856 = vmatpush3.bf16.msra.mxu1 %v920_v49  ;;  %826 = vmatprep.subr.bf16.mxu0 %v923_v50 }
  0x52   :  { %849 = vmatprep.subr.bf16.mxu1 %v923_v50 }
  0x54   :  { %827 = vmatpush3.bf16.msra.mxu0 %v924_v51 }
  0x55   :  { %857 = vmatpush3.bf16.msra.mxu1 %v924_v51  ;;  %828 = vmatprep.subr.bf16.mxu0 %v925_v53 }
  0x56   :  { %850 = vmatprep.subr.bf16.mxu1 %v925_v53 }
  0x58   :  { %829 = vmatpush3.bf16.msra.mxu0 %v926_v55 }
  0x59   :  { %858 = vmatpush3.bf16.msra.mxu1 %v926_v55  ;;  %830 = vmatprep.subr.bf16.mxu0 %v927_v56 }
  0x5a   :  { %851 = vmatprep.subr.bf16.mxu1 %v927_v56 }
  0x5c   :  { %831 = vmatpush3.bf16.msra.mxu0 %v928_v57 }
  0x5d   :  { %859 = vmatpush3.bf16.msra.mxu1 %v928_v57 }
  0x5f   :  { %634 = vmatmul.mubr.bf16.vlgmr.msra.gmra.mxu0 %v929_v58 }
  0x60   :  { %642 = vmatmul.mubr.bf16.vlgmr.msra.gmra.mxu1 %v932_v59 }
  0xff   :  { %v776_v60 = vpop.f32.mrf.mxu0 }
 0x100   :  { %v804_v61 = vpop.f32.mrf.mxu1 }
 0x101   :  { %v777_v62 = vpop.f32.mrf.mxu0 }
 0x102   :  { %v805_v63 = vpop.f32.mrf.mxu1  ;;  %v778_v11 = vadd.f32 %v777_v62, %v776_v60 }
 0x103   :  { %v779_v0 = vpop.f32.mrf.mxu0  ;;  %v806_v12 = vadd.f32 %v805_v63, %v804_v61 }
 0x104   :  { %v807_v1 = vpop.f32.mrf.mxu1 }
 0x105   :  { %v780_v2 = vpop.f32.mrf.mxu0  ;;  %v587_v19 = vadd.f32 %v806_v12, %v778_v11 }
 0x106   :  { %v808_v3 = vpop.f32.mrf.mxu1  ;;  %v781_v20 = vadd.f32 %v780_v2, %v779_v0 }
 0x107   :  { %v782_v4 = vpop.f32.mrf.mxu0  ;;  %v809_v21 = vadd.f32 %v808_v3, %v807_v1 }
 0x108   :  { %v810_v5 = vpop.f32.mrf.mxu1 }
 0x109   :  { %v783_v6 = vpop.f32.mrf.mxu0  ;;  %v590_v35 = vadd.f32 %v809_v21, %v781_v20 }
 0x10a   :  { %v811_v7 = vpop.f32.mrf.mxu1  ;;  %v784_v14 = vadd.f32 %v783_v6, %v782_v4 }
 0x10b   :  { %v785_v8 = vpop.f32.mrf.mxu0  ;;  %v812_v15 = vadd.f32 %v811_v7, %v810_v5 }
 0x10c   :  { %v813_v9 = vpop.f32.mrf.mxu1 }
 0x10d   :  { %v786_v10 = vpop.f32.mrf.mxu0  ;;  %v595_v24 = vadd.f32 %v812_v15, %v784_v14 }
 0x10e   :  { %v814_v13 = vpop.f32.mrf.mxu1  ;;  %v787_v25 = vadd.f32 %v786_v10, %v785_v8 }
 0x10f   :  { %v815_v26 = vadd.f32 %v814_v13, %v813_v9 }
 0x111   :  { %v598_v39 = vadd.f32 %v815_v26, %v787_v25 }
 0x11f   :  { %v832_v16 = vpop.f32.mrf.mxu0 }
 0x120   :  { %v838_v17 = vpop.f32.mrf.mxu1 }
 0x121   :  { %v833_v18 = vpop.f32.mrf.mxu0 }
 0x122   :  { %v834_v22 = vadd.f32 %v833_v18, %v832_v16  ;;  %v839_v23 = vpop.f32.mrf.mxu1 }
 0x123   :  { %v840_v28 = vadd.f32 %v839_v23, %v838_v17  ;;  %v835_v29 = vpop.f32.mrf.mxu0 }
 0x124   :  { %v636_v30 = vadd.f32 %v834_v22, %v587_v19  ;;  %v841_v31 = vpop.f32.mrf.mxu1 }
 0x125   :  { %v644_v33 = vadd.f32 %v840_v28, %v595_v24  ;;  %v836_v34 = vpop.f32.mrf.mxu0 }
 0x126   :  { %v657_v36 = vmul.f32 %v758_v27, %v636_v30  ;;  %v837_v37 = vadd.f32 %v836_v34, %v835_v29  ;;  %v842_v38 = vpop.f32.mrf.mxu1 }
 0x127   :  { %v659_v40 = vmul.f32 %v758_v27, %v644_v33  ;;  %v843_v41 = vadd.f32 %v842_v38, %v841_v31 }
 0x128   :  { %v668_v42 = vadd.f32 %v759_v32, %v657_v36  ;;  %v639_v43 = vadd.f32 %v837_v37, %v590_v35 }
 0x129   :  { %v670_v44 = vadd.f32 %v759_v32, %v659_v40  ;;  %v647_v45 = vadd.f32 %v843_v41, %v598_v39 }
 0x12a   :  { %v672_v46 = vmax.f32 %v668_v42, 0.0  ;;  %v658_v47 = vmul.f32 %v758_v27, %v639_v43 }
 0x12b   :  { %v674_v48 = vmax.f32 %v670_v44, 0.0  ;;  %v660_v49 = vmul.f32 %v758_v27, %v647_v45 }
 0x12c   :  { %676 = vst [vmem:[#allocation7] sm:$0xff] %v672_v46  ;;  %v669_v50 = vadd.f32 %v759_v32, %v658_v47 }
 0x12d   :  { %678 = vst [vmem:[#allocation7 + $0x10] sm:$0xff] %v674_v48  ;;  %v671_v51 = vadd.f32 %v759_v32, %v660_v49 }
 0x12e   :  { %v673_v52 = vmax.f32 %v669_v50, 0.0 }
 0x12f   :  { %v675_v53 = vmax.f32 %v671_v51, 0.0 }
 0x130   :  { %677 = vst [vmem:[#allocation7 + $0x8] sm:$0xff] %v673_v52 }
 0x131   :  { %679 = vst [vmem:[#allocation7 + $0x18] sm:$0xff] %v675_v53 }
 0x132   :  { %986 = shalt.err (!%p983_p0)
}
 0x133   :  { %s1008_s6 = smov 128   ;;  %s1009_s7 = smov 8  }
 0x134   :  { %691 = dma.vmem_to_hbm [thread:$0]  %s686_s5, 512, %s1054_s4, [#allocation4], %s1008_s6, %s1008_s6, %s1009_s7  }
 0x135   :  { %999 = dma.done.wait [#allocation4], 512  }
 0x136   :  { %1000 = vsyncadd [#allocation4], 4294966784 }
 0x137   :  { %695 = vsyncpa [#allocation3], 1 }
 0x138   :  { %696 = vsyncpa [#allocation6], 1 }
 0x139   :  { %697 = vsyncpa [#allocation4], 1 }

</bundles_post_ra>
